<compile_context>
chip_gen: v7x
topology: tpu7x:2x2x1
jax: 0.10.0
libtpu: 0.0.40
codegen_flags: <defaults>
</compile_context>

<pallas_src>
import functools
import math

import jax
import jax.numpy as jnp
from jax.experimental import pallas as pl
from jax.experimental.pallas import tpu as pltpu


# ------------------------------- tile pickers --------------------------------
def _pick_time_tile(t, ksz, cap=512):
    """Time tile: whole axis if small, else largest mult-of-8 divisor <= cap.
    If no divisor exists, return cap and let the wrapper pad T (hardened)."""
    lo = max(ksz - 1, 1)
    if t <= cap:
        return max(t, lo)
    hi = cap - cap % 8
    for cand in range(hi, 7, -8):
        if cand >= lo and t % cand == 0:
            return cand
    return max(hi, ((lo + 7) // 8) * 8)   # wrapper pads T up to a multiple


def _pick_lane_block(bcp):
    """Lane block (bcp is a multiple of 128). Prefer >= 2 chunks so the
    'parallel' lane axis can be split across v7x's two TensorCores."""
    assert bcp % 128 == 0
    if bcp == 128:
        return 128
    hi = min(1024, bcp // 2)
    hi -= hi % 128
    for cand in range(hi, 127, -128):
        if bcp % cand == 0:
            return cand
    return bcp


# -------------------------------- Pallas kernel ------------------------------
def _lconv_kernel(x_next_ref, w_ref, b_ref, o_ref, win_ref, tail_ref, *,
                  tile_t, ksz, pad_l, align_l):
    """One (lane_chunk, time) grid step.

    Grid: (num_lane_chunks, num_time_tiles + 1); the time axis is sequential.
    At time-step ti:
      * x_next_ref holds x tile min(ti, n_t-1)   (one-tile look-ahead)
      * win_ref rows [align_l, align_l+tile_t) hold x tile ti-1 (staged at the
        previous step, sublane-aligned so the staging store is a plain vst)
      * output time-tile ti-1 is computed/written (out index map: max(ti-1, 0))
    ti == 0 is a priming step (stage tile 0, write nothing).
    """
    ti = pl.program_id(1)
    last = pl.num_programs(1) - 1
    pad_r = ksz - 1 - pad_l
    mid = align_l                   # aligned start of the staged tile
    base = align_l - pad_l          # tap-0 read offset

    @pl.when(ti > 0)
    def _compute():
        # ---- left halo: tail of tile ti-2 (zeros at the sequence start) ----
        if pad_l > 0:
            @pl.when(ti == 1)
            def _():
                win_ref[mid - pad_l:mid, :] = jnp.zeros(
                    (pad_l, win_ref.shape[1]), win_ref.dtype)

            @pl.when(ti > 1)
            def _():
                win_ref[mid - pad_l:mid, :] = tail_ref[ksz - 1 - pad_l:, :]

        # ---- right halo: head of tile ti (zeros at the sequence end) ----
        if pad_r > 0:
            @pl.when(ti == last)
            def _():
                win_ref[mid + tile_t:mid + tile_t + pad_r, :] = jnp.zeros(
                    (pad_r, win_ref.shape[1]), win_ref.dtype)

            @pl.when(ti < last)
            def _():
                win_ref[mid + tile_t:mid + tile_t + pad_r, :] = \
                    x_next_ref[0:pad_r, :]

        # ---- K-tap depthwise conv over time, f32 accumulation ----
        w = w_ref[...].astype(jnp.float32)              # (K, L), loaded once
        acc = jnp.zeros(o_ref.shape, jnp.float32)
        for k in range(ksz):                            # static unroll, K taps
            acc = acc + (win_ref[base + k:base + k + tile_t, :]
                         .astype(jnp.float32) * w[k:k + 1, :])
        acc = acc + b_ref[...].astype(jnp.float32)      # (1, L) broadcast
        o_ref[...] = acc.astype(o_ref.dtype)

    # ---- carry update (every step, including the priming step ti == 0):
    # save the tail of the current staged tile, then stage the look-ahead tile
    # (aligned full-width store) as the new mid for the next step.
    if ksz > 1:
        tail_ref[...] = win_ref[mid + tile_t - (ksz - 1):mid + tile_t, :]
    win_ref[mid:mid + tile_t, :] = x_next_ref[...]


# --------------------------------- wrapper -----------------------------------
def lightweight_conv1d_tbc(x, weight, bias, *, kernel_size, padding_l,
                           num_heads, weight_softmax,
                           time_tile=None, lane_block=None, io_dtype=None):
    """Forward of LightweightConv1dTBC (eval mode, no dropout).

    x:      (T, B, C) float32 or bfloat16
    weight: (H, 1, K) float32
    bias:   (C,) float32 or None
    io_dtype: optional HBM I/O dtype (e.g. jnp.bfloat16); accumulation is f32.
    returns (T, B, C) in io_dtype (or x.dtype if io_dtype is None)
    """
    t, b, c = x.shape
    h, _, ksz = weight.shape
    assert h == num_heads and ksz == kernel_size
    r = c // h
    assert r * h == c
    assert 0 <= padding_l <= ksz - 1, "padding_l must lie in [0, kernel_size-1]"

    io_dt = x.dtype if io_dtype is None else jax.dtypes.canonicalize_dtype(io_dtype)
    pad_l = padding_l
    pad_r = ksz - 1 - pad_l

    # ---- tiny parameter prep (plain JAX) ----
    w_hk = weight.reshape(h, ksz).astype(jnp.float32)
    if weight_softmax:
        w_hk = jax.nn.softmax(w_hk, axis=1)
    w_kc = jnp.repeat(w_hk, r, axis=0).T                       # (K, C)
    w_kl = jnp.tile(w_kc, (1, b))                              # (K, B*C)
    bias_vec = bias if bias is not None else jnp.zeros((c,), jnp.float32)
    bias_l = jnp.tile(bias_vec.astype(jnp.float32), b)[None, :]  # (1, B*C)

    # ---- fold batch into lanes; pad lanes to a multiple of 128 (full vst) ----
    bc = b * c
    x2 = x.reshape(t, bc).astype(io_dt)
    bc_pad = max(128, -(-bc // 128) * 128)

    # ---- time tiling (cap 512 rows; pad T if no clean divisor) ----
    tile_t = time_tile if time_tile is not None else _pick_time_tile(t, ksz)
    assert tile_t >= max(ksz - 1, 1), "time tile must cover the K-1 halo"
    t_pad = -(-t // tile_t) * tile_t

    if t_pad != t or bc_pad != bc:
        x2 = jnp.pad(x2, ((0, t_pad - t), (0, bc_pad - bc)))
        w_kl = jnp.pad(w_kl, ((0, 0), (0, bc_pad - bc)))
        bias_l = jnp.pad(bias_l, ((0, 0), (0, bc_pad - bc)))

    lblk = lane_block if lane_block is not None else _pick_lane_block(bc_pad)
    assert bc_pad % lblk == 0
    n_t = t_pad // tile_t
    n_l = bc_pad // lblk

    # ---- sublane-aligned staging offset for the window scratch ----
    isz = io_dt.itemsize
    sub = max(8, 32 // isz)                     # 8 (f32) / 16 (bf16)
    align_l = (-(-pad_l // sub) * sub) if pad_l > 0 else 0
    win_rows = align_l + tile_t + pad_r

    kernel = functools.partial(_lconv_kernel, tile_t=tile_t, ksz=ksz,
                               pad_l=pad_l, align_l=align_l)

    # ---- VMEM budget (double-buffered x/out + window/tail scratch + f32 acc),
    # capped at ~75% of the generation's physical VMEM ----
    blk = tile_t * lblk
    need = (2 * blk * isz + 2 * blk * isz + win_rows * lblk * isz
            + max(ksz - 1, 1) * lblk * isz + blk * 4
            + 2 * (ksz + 1) * lblk * 4)
    try:
        vmem_cap = pltpu.get_tpu_info().vmem_capacity_bytes
    except Exception:
        vmem_cap = 64 * 1024 * 1024
    vmem_limit = int(min(max(2 * need, 16 << 20), (3 * vmem_cap) // 4))

    out2 = pl.pallas_call(
        kernel,
        out_shape=jax.ShapeDtypeStruct((t_pad, bc_pad), io_dt),
        grid_spec=pltpu.PrefetchScalarGridSpec(
            num_scalar_prefetch=0,
            grid=(n_l, n_t + 1),            # +1 priming step for the look-ahead
            in_specs=[
                # x: look-ahead block (tile ti), clamped at the last step so the
                # last tile is never re-read (same block index -> no extra DMA)
                pl.BlockSpec((tile_t, lblk),
                             lambda li, ti: (jnp.minimum(ti, n_t - 1), li)),
                pl.BlockSpec((ksz, lblk), lambda li, ti: (0, li)),
                pl.BlockSpec((1, lblk), lambda li, ti: (0, li)),
            ],
            # Output block for ti=0 and ti=1 shares index 0 and is only written
            # at ti=1; Pallas only flushes an output buffer when its block index
            # changes, so the untouched priming-step buffer is never written back.
            out_specs=pl.BlockSpec((tile_t, lblk),
                                   lambda li, ti: (jnp.maximum(ti - 1, 0), li)),
            scratch_shapes=[
                pltpu.VMEM((win_rows, lblk), io_dt),           # aligned window
                pltpu.VMEM((max(ksz - 1, 1), lblk), io_dt),    # previous-tile tail
            ],
        ),
        compiler_params=pltpu.CompilerParams(
            dimension_semantics=("parallel", "arbitrary"),
            vmem_limit_bytes=vmem_limit,
        ),
    )(x2, w_kl, bias_l)

    return out2[:t, :bc].reshape(t, b, c)


# ------------------------------ pure-JAX reference ---------------------------
def reference_forward(x, weight, bias, *, kernel_size, padding_l, num_heads,
                      weight_softmax):
    t, b, c = x.shape
    h = num_heads
    r = c // h
    w_hk = weight.reshape(h, kernel_size).astype(jnp.float32)
    if weight_softmax:
        w_hk = jax.nn.softmax(w_hk, axis=1)
    w_kc = jnp.repeat(w_hk, r, axis=0).T                       # (K, C)
    x_pad = jnp.pad(x, ((padding_l, kernel_size - 1 - padding_l), (0, 0), (0, 0)))
    out = jnp.zeros_like(x)
    for k in range(kernel_size):
        out = out + x_pad[k:k + t] * w_kc[k][None, None, :]
    if bias is not None:
        out = out + bias.reshape(1, 1, -1)
    return out


# ----------------------------------- main ------------------------------------
if __name__ == "__main__":
    key = jax.random.PRNGKey(0)

    # ---- test 1: module demo shape (single time tile, lane padding 64->128) --
    T, B, C, H, K, PAD_L = 16, 2, 32, 4, 3, 1
    k1, k2, key = jax.random.split(key, 3)
    fan_in, fan_out = 1 * K, H * K                  # xavier_uniform_ on (H,1,K)
    bound = math.sqrt(6.0 / (fan_in + fan_out))
    weight = jax.random.uniform(k2, (H, 1, K), jnp.float32, -bound, bound)
    bias = jnp.zeros((C,), jnp.float32)             # constant_(0.0)
    x = jax.random.normal(k1, (T, B, C), jnp.float32)

    out = lightweight_conv1d_tbc(x, weight, bias, kernel_size=K, padding_l=PAD_L,
                                 num_heads=H, weight_softmax=True)
    out = jax.block_until_ready(out)
    ref = reference_forward(x, weight, bias, kernel_size=K, padding_l=PAD_L,
                            num_heads=H, weight_softmax=True)
    assert out.shape == (T, B, C)
    assert jnp.allclose(out, ref, atol=1e-5, rtol=1e-5), "test1 mismatch"

    # ---- test 2: multi time tile (carried tail halo), 2 lane chunks,
    #              awkward T (padded) and B*C (padded), non-zero bias ----------
    T2, B2, C2, H2, K2, PAD2 = 40, 2, 96, 3, 4, 2
    k1, k2, k3, key = jax.random.split(key, 4)
    w2 = jax.random.normal(k1, (H2, 1, K2), jnp.float32) * 0.5
    b2 = jax.random.normal(k2, (C2,), jnp.float32)
    x2 = jax.random.normal(k3, (T2, B2, C2), jnp.float32)
    out2 = lightweight_conv1d_tbc(x2, w2, b2, kernel_size=K2, padding_l=PAD2,
                                  num_heads=H2, weight_softmax=True, time_tile=16)
    out2 = jax.block_until_ready(out2)
    ref2 = reference_forward(x2, w2, b2, kernel_size=K2, padding_l=PAD2,
                             num_heads=H2, weight_softmax=True)
    assert out2.shape == (T2, B2, C2)
    assert jnp.allclose(out2, ref2, atol=1e-5, rtol=1e-5), "test2 mismatch"

    # ---- test 3: bf16 HBM I/O path (f32 in-kernel accumulation) --------------
    out3 = lightweight_conv1d_tbc(x2, w2, b2, kernel_size=K2, padding_l=PAD2,
                                  num_heads=H2, weight_softmax=True, time_tile=16,
                                  io_dtype=jnp.bfloat16)
    out3 = jax.block_until_ready(out3)
    assert out3.dtype == jnp.bfloat16
    assert jnp.allclose(out3.astype(jnp.float32), ref2,
                        atol=5e-2, rtol=5e-2), "test3 mismatch"

    print("KERNEL_OK")
</pallas_src>

<mosaic_0001>
module attributes {stable_mosaic.version = 11 : i64} {
  func.func @_lconv_kernel(%arg0: i32, %arg1: i32, %arg2: memref<16x128xf32, #tpu.memory_space<vmem>>, %arg3: memref<3x128xf32, #tpu.memory_space<vmem>>, %arg4: memref<1x128xf32, #tpu.memory_space<vmem>>, %arg5: memref<16x128xf32, #tpu.memory_space<vmem>>, %arg6: memref<25x128xf32, #tpu.memory_space<vmem>>, %arg7: memref<2x128xf32, #tpu.memory_space<vmem>>) attributes {dimension_semantics = [#tpu.dimension_semantics<parallel>, #tpu.dimension_semantics<arbitrary>], iteration_bounds = array<i64: 1, 2>, scalar_prefetch = 0 : i64, scratch_operands = 2 : i64, tpu.core_type = #tpu.core_type<tc>, window_params = [{transform_indices = @transform_0, window_bounds = array<i64: 16, 128>}, {transform_indices = @transform_1, window_bounds = array<i64: 3, 128>}, {transform_indices = @transform_2, window_bounds = array<i64: 1, 128>}, {transform_indices = @transform_3, window_bounds = array<i64: 16, 128>}]} {
    %c0_i32 = arith.constant 0 : i32
    %0 = arith.cmpi sgt, %arg1, %c0_i32 : i32
    %1 = arith.extui %0 : i1 to i32
    %c0_i32_0 = arith.constant 0 : i32
    %2 = arith.cmpi ne, %1, %c0_i32_0 : i32
    scf.if %2 {
      %c1_i32 = arith.constant 1 : i32
      %7 = arith.cmpi eq, %arg1, %c1_i32 : i32
      %8 = arith.extui %7 : i1 to i32
      %c0_i32_6 = arith.constant 0 : i32
      %9 = arith.cmpi ne, %8, %c0_i32_6 : i32
      scf.if %9 {
        %cst_23 = arith.constant 0.000000e+00 : f32
        %40 = vector.broadcast %cst_23 : f32 to vector<1x128xf32>
        %c7_24 = arith.constant 7 : index
        %c0_25 = arith.constant 0 : index
        %41 = vector.load %arg6[%c7_24, %c0_25] : memref<25x128xf32, #tpu.memory_space<vmem>>, vector<1x128xf32>
        tpu.vector_store %arg6[%c7_24, %c0_25], %40 {strides = array<i32>} : memref<25x128xf32, #tpu.memory_space<vmem>>, vector<1x128xf32>,
      } else {
      }
      %c1_i32_7 = arith.constant 1 : i32
      %10 = arith.cmpi sgt, %arg1, %c1_i32_7 : i32
      %11 = arith.extui %10 : i1 to i32
      %c0_i32_8 = arith.constant 0 : i32
      %12 = arith.cmpi ne, %11, %c0_i32_8 : i32
      scf.if %12 {
        %c1 = arith.constant 1 : index
        %c0_23 = arith.constant 0 : index
        %40 = vector.load %arg7[%c1, %c0_23] : memref<2x128xf32, #tpu.memory_space<vmem>>, vector<1x128xf32>
        %c7_24 = arith.constant 7 : index
        %c0_25 = arith.constant 0 : index
        %41 = vector.load %arg6[%c7_24, %c0_25] : memref<25x128xf32, #tpu.memory_space<vmem>>, vector<1x128xf32>
        tpu.vector_store %arg6[%c7_24, %c0_25], %40 {strides = array<i32>} : memref<25x128xf32, #tpu.memory_space<vmem>>, vector<1x128xf32>,
      } else {
      }
      %c1_i32_9 = arith.constant 1 : i32
      %13 = arith.cmpi eq, %arg1, %c1_i32_9 : i32
      %14 = arith.extui %13 : i1 to i32
      %c0_i32_10 = arith.constant 0 : i32
      %15 = arith.cmpi ne, %14, %c0_i32_10 : i32
      scf.if %15 {
        %cst_23 = arith.constant 0.000000e+00 : f32
        %40 = vector.broadcast %cst_23 : f32 to vector<1x128xf32>
        %c24 = arith.constant 24 : index
        %c0_24 = arith.constant 0 : index
        %41 = vector.load %arg6[%c24, %c0_24] : memref<25x128xf32, #tpu.memory_space<vmem>>, vector<1x128xf32>
        tpu.vector_store %arg6[%c24, %c0_24], %40 {strides = array<i32>} : memref<25x128xf32, #tpu.memory_space<vmem>>, vector<1x128xf32>,
      } else {
      }
      %c1_i32_11 = arith.constant 1 : i32
      %16 = arith.cmpi slt, %arg1, %c1_i32_11 : i32
      %17 = arith.extui %16 : i1 to i32
      %c0_i32_12 = arith.constant 0 : i32
      %18 = arith.cmpi ne, %17, %c0_i32_12 : i32
      scf.if %18 {
        %c0_23 = arith.constant 0 : index
        %c0_24 = arith.constant 0 : index
        %40 = vector.load %arg2[%c0_23, %c0_24] : memref<16x128xf32, #tpu.memory_space<vmem>>, vector<1x128xf32>
        %c24 = arith.constant 24 : index
        %c0_25 = arith.constant 0 : index
        %41 = vector.load %arg6[%c24, %c0_25] : memref<25x128xf32, #tpu.memory_space<vmem>>, vector<1x128xf32>
        tpu.vector_store %arg6[%c24, %c0_25], %40 {strides = array<i32>} : memref<25x128xf32, #tpu.memory_space<vmem>>, vector<1x128xf32>,
      } else {
      }
      %c0_13 = arith.constant 0 : index
      %c0_14 = arith.constant 0 : index
      %19 = vector.load %arg3[%c0_13, %c0_14] : memref<3x128xf32, #tpu.memory_space<vmem>>, vector<3x128xf32>
      %cst = arith.constant 0.000000e+00 : f32
      %20 = vector.broadcast %cst : f32 to vector<16x128xf32>
      %c7 = arith.constant 7 : index
      %c0_15 = arith.constant 0 : index
      %21 = vector.load %arg6[%c7, %c0_15] : memref<25x128xf32, #tpu.memory_space<vmem>>, vector<16x128xf32>
      %22 = vector.extract_strided_slice %19 {offsets = [0, 0], sizes = [1, 128], strides = [1, 1]} : vector<3x128xf32> to vector<1x128xf32>
      %23 = vector.broadcast %22 : vector<1x128xf32> to vector<16x128xf32>
      %24 = arith.mulf %21, %23 : vector<16x128xf32>
      %25 = arith.addf %20, %24 : vector<16x128xf32>
      %c8_16 = arith.constant 8 : index
      %c0_17 = arith.constant 0 : index
      %26 = vector.load %arg6[%c8_16, %c0_17] : memref<25x128xf32, #tpu.memory_space<vmem>>, vector<16x128xf32>
      %27 = vector.extract_strided_slice %19 {offsets = [1, 0], sizes = [1, 128], strides = [1, 1]} : vector<3x128xf32> to vector<1x128xf32>
      %28 = vector.broadcast %27 : vector<1x128xf32> to vector<16x128xf32>
      %29 = arith.mulf %26, %28 : vector<16x128xf32>
      %30 = arith.addf %25, %29 : vector<16x128xf32>
      %c9 = arith.constant 9 : index
      %c0_18 = arith.constant 0 : index
      %31 = vector.load %arg6[%c9, %c0_18] : memref<25x128xf32, #tpu.memory_space<vmem>>, vector<16x128xf32>
      %32 = vector.extract_strided_slice %19 {offsets = [2, 0], sizes = [1, 128], strides = [1, 1]} : vector<3x128xf32> to vector<1x128xf32>
      %33 = vector.broadcast %32 : vector<1x128xf32> to vector<16x128xf32>
      %34 = arith.mulf %31, %33 : vector<16x128xf32>
      %35 = arith.addf %30, %34 : vector<16x128xf32>
      %c0_19 = arith.constant 0 : index
      %c0_20 = arith.constant 0 : index
      %36 = vector.load %arg4[%c0_19, %c0_20] : memref<1x128xf32, #tpu.memory_space<vmem>>, vector<1x128xf32>
      %37 = vector.broadcast %36 : vector<1x128xf32> to vector<16x128xf32>
      %38 = arith.addf %35, %37 : vector<16x128xf32>
      %c0_21 = arith.constant 0 : index
      %c0_22 = arith.constant 0 : index
      %39 = vector.load %arg5[%c0_21, %c0_22] : memref<16x128xf32, #tpu.memory_space<vmem>>, vector<16x128xf32>
      tpu.vector_store %arg5[%c0_21, %c0_22], %38 {strides = array<i32>} : memref<16x128xf32, #tpu.memory_space<vmem>>, vector<16x128xf32>,
    } else {
    }
    %c22 = arith.constant 22 : index
    %c0 = arith.constant 0 : index
    %3 = vector.load %arg6[%c22, %c0] : memref<25x128xf32, #tpu.memory_space<vmem>>, vector<2x128xf32>
    %c0_1 = arith.constant 0 : index
    %c0_2 = arith.constant 0 : index
    %4 = vector.load %arg7[%c0_1, %c0_2] : memref<2x128xf32, #tpu.memory_space<vmem>>, vector<2x128xf32>
    tpu.vector_store %arg7[%c0_1, %c0_2], %3 {strides = array<i32>} : memref<2x128xf32, #tpu.memory_space<vmem>>, vector<2x128xf32>,
    %c0_3 = arith.constant 0 : index
    %c0_4 = arith.constant 0 : index
    %5 = vector.load %arg2[%c0_3, %c0_4] : memref<16x128xf32, #tpu.memory_space<vmem>>, vector<16x128xf32>
    %c8 = arith.constant 8 : index
    %c0_5 = arith.constant 0 : index
    %6 = vector.load %arg6[%c8, %c0_5] : memref<25x128xf32, #tpu.memory_space<vmem>>, vector<16x128xf32>
    tpu.vector_store %arg6[%c8, %c0_5], %5 {strides = array<i32>} : memref<25x128xf32, #tpu.memory_space<vmem>>, vector<16x128xf32>,
    return
  }
  func.func @transform_0(%arg0: i32, %arg1: i32) -> (i32, i32) {
    %c0_i32 = arith.constant 0 : i32
    %0 = arith.minsi %arg1, %c0_i32 : i32
    %c0_i32_0 = arith.constant 0 : i32
    return %0, %arg0 : i32, i32
  }
  func.func @transform_1(%arg0: i32, %arg1: i32) -> (i32, i32) {
    %c0_i32 = arith.constant 0 : i32
    %c0_i32_0 = arith.constant 0 : i32
    return %c0_i32, %arg0 : i32, i32
  }
  func.func @transform_2(%arg0: i32, %arg1: i32) -> (i32, i32) {
    %c0_i32 = arith.constant 0 : i32
    %c0_i32_0 = arith.constant 0 : i32
    return %c0_i32, %arg0 : i32, i32
  }
  func.func @transform_3(%arg0: i32, %arg1: i32) -> (i32, i32) {
    %c1_i32 = arith.constant 1 : i32
    %0 = arith.subi %arg1, %c1_i32 : i32
    %c0_i32 = arith.constant 0 : i32
    %1 = arith.maxsi %0, %c0_i32 : i32
    %c0_i32_0 = arith.constant 0 : i32
    return %1, %arg0 : i32, i32
  }
}

</mosaic_0001>

<bundles_post_ra>
// kernel: tpu_custom_call.1
= control target key start
LH: loop header
LB: loop body
LE: loop exit
PB: predicated region body
PF: predicated region fallthrough
CT: control target
= control target key end

     0   :  { %8 = vsyncpa [#allocation5], 0  ;;  %s993_s0 = inlined_call_operand.hbm [shape: f32[16,128], index: 0, kind: input, shape index: {}]   ;;  %s994_s1 = inlined_call_operand.hbm [shape: f32[3,128], index: 1, kind: input, shape index: {}]   ;;  %s995_s2 = inlined_call_operand.vmem [shape: f32[1,128], index: 2, kind: input, shape index: {}]   ;;  %s996_s3 = inlined_call_operand.hbm [shape: f32[16,128], index: 3, kind: output, shape index: {}]  }
   0x1   :  { %10 = vsyncpa [#allocation5 + $0x1], 0 }
   0x2   :  { %11 = vsyncpa [#allocation8], 0 }
   0x3   :  { %12 = vsyncpa [#allocation6], 0 }
   0x4   :  { %14 = vsyncpa [#allocation6 + $0x1], 0  ;;  %s784_s12 = smov 0   ;;  %s786_s13 = smov 0  }
   0x5   :  { %s788_s14 = smov 0   ;;  %s790_s15 = smov 0  }
   0x6   :  { %s792_s16 = smov 0   ;;  %s794_s17 = smov 0  }
   0x7   :  { %s796_s18 = smov 0  }
   0x8 LB: > { %s459_s19 = sadd.s32 4294967295, %s753_s18   ;;  %s460_s20 = sadd.s32 4294967294, %s753_s18   ;;  %s753_s18 = sphi %s796_s18, %s20_s18   ;;  %s749_s17 = sphi %s794_s17, %s1022_s17   ;;  %s745_s16 = sphi %s792_s16, %s1021_s16   ;;  %s741_s15 = sphi %s790_s15, %s983_s15   ;;  %s737_s14 = sphi %s788_s14, %s1020_s14   ;;  %s733_s13 = sphi %s786_s13, %s978_s13   ;;  %s729_s12 = sphi %s784_s12, %s1019_s12  }
   0x9   : > { %p725_p0 = scmp.ne.s32.totalorder %s741_s15, 0  ;;  %p53_p1 = scmp.eq.s32.totalorder %s753_s18, 0 }
   0xa   : > { %p58_p2 = scmp.ne.s32.totalorder %s741_s15, %s737_s14  ;;  %p822_p3 = scmp.eq.s32.totalorder %s459_s19, 0 }
   0xb   : > { %p826_p4 = por %p725_p0, %p53_p1  ;;  %p726_p5 = scmp.ne.s32.totalorder %s733_s13, 0 }
   0xc   : > { %s1003_s21 = scalar_select %p822_p3, 1, 0 }
   0xd   : > { %p833_p6 = por %p822_p3, %p58_p2  ;;  %p142_p7 = scmp.eq.s32.totalorder %s459_s19, 1 }
   0xe   : > { %p147_p8 = scmp.ne.s32.totalorder %s733_s13, %s729_s12  ;;  %p148_p9 = scmp.eq.s32.totalorder %s460_s20, 1 }
   0xf   : > { %s1005_s23 = scalar_select %p833_p6, 1, 0 }
  0x10   : > { %p839_p10 = por %p726_p5, %p142_p7  ;;  %p463_p11 = scmp.ge.s32.totalorder %s753_s18, 1 }
  0x11   : > { %p844_p12 = por %p148_p9, %p147_p8  ;;  %p155_p13 = scmp.lt.s32.totalorder %s753_s18, 3 }
  0x12   : > { %s1006_s24 = scalar_select %p839_p10, 1, 0 }
  0x13   : > { %s1007_s25 = scalar_select %p844_p12, 1, 0 }
  0x14   : > { %p849_p0 = pnand %p463_p11, %p155_p13  ;;  %s755_s27 = smov [#allocation7]  }
  0x15   : > { %s170_s28 = sshll.u32 %s755_s27, 4  ;;  %p509_p5 = scmp.lt.s32.totalorder %s753_s18, 2  ;;  %s171_s28 = int_to_ptr.vmem [resolvable:$true] %s170_s28 }
  0x16   : > { %s1008_s26 = scalar_select %p849_p0, 1, 0 }
  0x17   : > { %p496_p2 = pneg %p849_p0  ;;  %p865_p8 = pnand %p509_p5, %p826_p4 }
  0x18   : > { %s591_s6 = scalar_lea.hbm %s994_s1, 64 }
  0x19   : > { %p859_p7 = pnand %p496_p2, %p822_p3  ;;  %p592_p9 = scmp.ne.s32.totalorder %s994_s1, %s591_s6 }
  0x1a   : > { %s1010_s30 = scalar_select %p865_p8, 1, 0 }
  0x1b   : > { %p593_p11 = pneg %p859_p7  ;;  %p598_p1 = scmp.lt.u32.totalorder %s591_s6, %s994_s1 }
  0x1d   : > { %p594_p13 = pnand %p593_p11, %p592_p9 }
  0x1f   : > { %p595_p2 = pneg %p594_p13 }
  0x21   : > { %p600_p4 = pnand %p598_p1, %p595_p2 }
  0x23   : > { %603 = shalt.err (!%p600_p4)
}
  0x24   : > { %s604_s11 = scalar_lea.vmem %s171_s28, 64  ;;  %p612_p3 = scmp.lt.s32.totalorder %s171_s28, %s171_s28 }
  0x25   : > { %p605_p5 = scmp.ne.s32.totalorder %s171_s28, %s604_s11  ;;  %p613_p6 = scmp.lt.s32.totalorder %s604_s11, %s604_s11 }
  0x27   : > { %p607_p12 = pnand %p605_p5, %p593_p11  ;;  %p614_p0 = por %p613_p6, %p612_p3 }
  0x29   : > { %p608_p10 = pneg %p607_p12 }
  0x2b   : > { %p615_p8 = pnand %p614_p0, %p608_p10 }
  0x2d   : > { %618 = shalt.err (!%p615_p8)
}
  0x2e   : > { %499 = dma.hbm_to_vmem [thread:$0]  (!%p859_p7), %s994_s1, 64, %s171_s28, [#allocation8]  }
  0x2f   : > { %s29_s20 = sadd.s32 1, %s749_s17  ;;  %s756_s22 = smov [#allocation4]  }
  0x30   : > { %p30_p1 = scmp.ge.s32.totalorder %s29_s20, 2  ;;  %s201_s27 = sshll.u32 %s756_s22, 4  ;;  %s202_s27 = int_to_ptr.vmem [resolvable:$true] %s201_s27 }
  0x31   : > { %s619_s6 = scalar_lea.hbm %s993_s0, 256  ;;  %p1011_p6 = scmp.ne.s32.totalorder %s1010_s30, 0 }
  0x32   : > { %s1024_s20 = smov (%p30_p1, %s29_s20), 0  ;;  %p620_p3 = scmp.ne.s32.totalorder %s993_s0, %s619_s6 }
  0x33   : > { %p621_p10 = pneg %p1011_p6  ;;  %p626_p7 = scmp.lt.u32.totalorder %s619_s6, %s619_s6 }
  0x34   : > { %p628_p8 = scmp.lt.u32.totalorder %s619_s6, %s993_s0 }
  0x35   : > { %p622_p12 = pnand %p621_p10, %p620_p3 }
  0x36   : > { %p629_p9 = por %p628_p8, %p626_p7 }
  0x37   : > { %p623_p0 = pneg %p622_p12 }
  0x39   : > { %p630_p11 = pnand %p629_p9, %p623_p0 }
  0x3b   : > { %633 = shalt.err (!%p630_p11)
}
  0x3c   : > { %s634_s9 = scalar_lea.vmem %s202_s27, 256  ;;  %s641_s10 = scalar_lea.vmem %s202_s27, 512 }
  0x3d   : > { %p635_p13 = scmp.ne.s32.totalorder %s202_s27, %s634_s9  ;;  %p642_p5 = scmp.lt.s32.totalorder %s202_s27, %s202_s27 }
  0x3e   : > { %p643_p1 = scmp.lt.s32.totalorder %s641_s10, %s634_s9 }
  0x3f   : > { %p637_p2 = pnand %p635_p13, %p621_p10 }
  0x40   : > { %p644_p6 = por %p643_p1, %p642_p5 }
  0x41   : > { %p638_p4 = pneg %p637_p2 }
  0x43   : > { %p645_p3 = pnand %p644_p6, %p638_p4 }
  0x45   : > { %648 = shalt.err (!%p645_p3)
}
  0x46   : > { %s757_s11 = smov 128   ;;  %s758_s14 = smov 8  }
  0x47   : > { %p1012_p12 = scmp.ne.s32.totalorder %s1010_s30, 0  ;;  %p1013_p0 = scmp.ne.s32.totalorder %s1008_s26, 0 }
  0x48   : > { %s215_s4 = sand.u32 (!%p1013_p0), 1, %s741_s15   ;;  %p1014_p6 = scmp.ne.s32.totalorder (!%p1013_p0), %s1005_s23, 0 }
  0x49   : > { %503 = dma.hbm_to_vmem [thread:$0]  (!%p1012_p12), %s993_s0, 256, %s202_s27, [#allocation5], %s757_s11, %s757_s11, %s758_s14  }
  0x4a   : > { %213 = sbr.rel (%p1013_p0) target bundleno = 172 (0xac), region = 32  ;;  %s471_s5 = sshll.u32 (!%p1013_p0), %s215_s4, 4 }
  0x4b   : > { %s216_s6 = scalar_lea.sflag (!%p1013_p0), [#allocation5], %s215_s4  ;;  %s907_s7 = scalar_lea.vmem (!%p1013_p0), [#allocation4], %s471_s5 }
  0x51   : > { %714 = dma.done.wait (%p1014_p6), %s216_s6, 256  }
  0x52   : > { %716 = vsyncadd (%p1014_p6), %s216_s6, 4294967040  ;;  %p1015_p10 = scmp.ne.s32.totalorder %s1003_s21, 0 }
  0x54   : > { %718 = dma.done.wait (%p1015_p10), [#allocation8], 64  }
  0x55   : > { %720 = vsyncadd (%p1015_p10), [#allocation8], 4294967232  ;;  %s246_s26 = sand.u32 1, %s733_s13   ;;  %p474_p7 = scmp.le.s32.totalorder %s745_s16, 0 }
  0x56   : > { %s473_s30 = sshll.u32 %s246_s26, 4  ;;  %p475_p8 = scmp.ne.s32.totalorder (!%p474_p7), %s745_s16, 1 }
  0x57   : > { %s920_s27 = scalar_lea.vmem [#allocation9], %s473_s30  ;;  %262 = sbr.rel (%p474_p7) target bundleno = 144 (0x90), region = 44 }
  0x5e   : > { %266 = sbr.rel (%p475_p8) target bundleno = 101 (0x65), region = 48  ;;  %v759_v0 = vmov (!%p475_p8), 0.0  }
  0x5f   : > { %267 = vst [vmem:[#allocation2 + $0x7] sm:$0x1] (!%p475_p8), %v759_v0 }
  0x65 PF: > { %p476_p9 = scmp.le.s32.totalorder %s745_s16, 1 }
  0x66   : > { %v272_v1 = vld [vmem:[#allocation3 + $0x1] sm:$0x1] (!%p476_p9) }
  0x67   : > { %271 = sbr.rel (%p476_p9) target bundleno = 110 (0x6e), region = 52  ;;  %273 = vst [vmem:[#allocation2 + $0x7] sm:$0x1] (!%p476_p9), %v272_v1 }
  0x6e PF: > { %276 = sbr.rel (%p475_p8) target bundleno = 117 (0x75), region = 56  ;;  %v760_v2 = vmov (!%p475_p8), 0.0  }
  0x6f   : > { %277 = vst [vmem:[#allocation2 + $0x18] sm:$0x1] (!%p475_p8), %v760_v2 }
  0x75 PF: > { %p478_p11 = scmp.ge.s32.totalorder %s745_s16, 1 }
  0x76   : > { %v282_v3 = vld [vmem:[%s907_s7] sm:$0x1] (!%p478_p11) }
  0x77   : > { %281 = sbr.rel (%p478_p11) target bundleno = 126 (0x7e), region = 60  ;;  %283 = vst [vmem:[#allocation2 + $0x18] sm:$0x1] (!%p478_p11), %v282_v3 }
  0x7e PF: > { %v287_v4 = vlaneseq  ;;  %v284_v6 = vld [vmem:[#allocation7] sm:$0x7]  ;;  %v285_v7 = vld [vmem:[#allocation2 + $0x7] sm:$0xff]  ;;  %v286_v13 = vld [vmem:[#allocation2 + $0xf] sm:$0xff] }
  0x7f   : > { %v295_v11 = vld [vmem:[#allocation2 + $0x8] sm:$0xff]  ;;  %v296_v17 = vld [vmem:[#allocation2 + $0x10] sm:$0xff]  ;;  %v479_v26 = vld [vmem:[%s995_s2] ss:$0 sm:$0xff] }
  0x80   : > { %v288_v5 = vshrl.u32 %v287_v4, 7  ;;  %v305_v12 = vld [vmem:[#allocation2 + $0x9] sm:$0xff]  ;;  %v306_v18 = vld [vmem:[#allocation2 + $0x11] sm:$0xff] }
  0x82   : > { %v289_v8 = vsub.s32 0, %v288_v5  ;;  %v299_v9 = vsub.s32 1, %v288_v5  ;;  %v309_v10 = vsub.s32 2, %v288_v5 }
  0x84   : > { %v290_v14 = vrot.slane %v284_v6, %v289_v8  ;;  %v300_v15 = vrot.slane %v284_v6, %v299_v9  ;;  %v310_v16 = vrot.slane %v284_v6, %v309_v10 }
  0x86   : > { %v291_v19 = vmul.f32 %v290_v14, %v285_v7  ;;  %v301_v20 = vmul.f32 %v300_v15, %v295_v11  ;;  %v311_v21 = vmul.f32 %v310_v16, %v305_v12  ;;  %v292_v22 = vmul.f32 %v290_v14, %v286_v13 }
  0x87   : > { %v302_v23 = vmul.f32 %v300_v15, %v296_v17  ;;  %v312_v24 = vmul.f32 %v310_v16, %v306_v18 }
  0x88   : > { %v303_v25 = vadd.f32 %v301_v20, %v291_v19 }
  0x89   : > { %v304_v27 = vadd.f32 %v302_v23, %v292_v22 }
  0x8a   : > { %v313_v28 = vadd.f32 %v311_v21, %v303_v25 }
  0x8b   : > { %v314_v29 = vadd.f32 %v312_v24, %v304_v27 }
  0x8c   : > { %v322_v30 = vadd.f32 %v479_v26, %v313_v28 }
  0x8d   : > { %v323_v31 = vadd.f32 %v479_v26, %v314_v29 }
  0x8e   : > { %324 = vst [vmem:[%s920_s27] sm:$0xff] %v322_v30 }
  0x8f   : > { %325 = vst [vmem:[%s920_s27 + $0x8] sm:$0xff] %v323_v31 }
  0x90 PF: > { %v326_v32 = vld [vmem:[#allocation2 + $0x16] sm:$0x3]  ;;  %v329_v34 = vld [vmem:[%s907_s7 + $0x8] sm:$0xff]  ;;  %s481_s8 = sadd.s32 4294967295, %s745_s16  ;;  %s350_s28 = sshll.u32 %s920_s27, 4  ;;  %s936_s28 = int_to_ptr.vmem [resolvable:$true] %s350_s28 }
  0x91   : > { %v328_v33 = vld [vmem:[%s907_s7] sm:$0xff]  ;;  %327 = vst [vmem:[#allocation3] sm:$0x3] %v326_v32  ;;  %331 = vst [vmem:[#allocation2 + $0x10] sm:$0xff] %v329_v34  ;;  %p341_p13 = scmp.gt.s32.totalorder %s481_s8, 0  ;;  %s945_s14 = scalar_lea.sflag [#allocation6], %s246_s26 }
  0x92   : > { %330 = vst [vmem:[#allocation2 + $0x8] sm:$0xff] %v328_v33  ;;  %s649_s16 = scalar_lea.vmem %s936_s28, 256  ;;  %p1016_p4 = scmp.ne.s32.totalorder %s1006_s24, 0 }
  0x93   : > { %s1026_s8 = smov (!%p341_p13, %s481_s8), 0  ;;  %p650_p2 = scmp.ne.s32.totalorder %s936_s28, %s649_s16 }
  0x94   : > { %s487_s29 = sshll.u32 %s1026_s8, 8  ;;  %s761_s19 = smov [#allocation9]  }
  0x95   : > { %s941_s11 = scalar_lea.hbm %s996_s3, %s487_s29  ;;  %p651_p5 = pnand %p650_p2, %p1016_p4 }
  0x96   : > { %s653_s22 = sshll.u32 %s761_s19, 4  ;;  %s654_s22 = int_to_ptr.vmem [resolvable:$false] %s653_s22 }
  0x97   : > { %p652_p1 = pneg %p651_p5  ;;  %s655_s4 = scalar_lea.vmem %s654_s22, 512 }
  0x98   : > { %p656_p3 = scmp.lt.s32.totalorder %s936_s28, %s654_s22  ;;  %p657_p12 = scmp.lt.s32.totalorder %s655_s4, %s649_s16 }
  0x9a   : > { %p658_p0 = por %p657_p12, %p656_p3 }
  0x9c   : > { %p659_p6 = pnand %p658_p0, %p652_p1 }
  0x9e   : > { %662 = shalt.err (!%p659_p6)
}
  0x9f   : > { %s663_s5 = scalar_lea.hbm %s941_s11, 256  ;;  %s667_s26 = scalar_lea.hbm %s996_s3, 256 }
  0xa0   : > { %p664_p10 = scmp.ne.s32.totalorder %s941_s11, %s663_s5  ;;  %p668_p9 = scmp.lt.u32.totalorder %s941_s11, %s996_s3 }
  0xa1   : > { %p669_p11 = scmp.lt.u32.totalorder %s667_s26, %s663_s5  ;;  %p671_p2 = scmp.lt.u32.totalorder %s663_s5, %s941_s11 }
  0xa2   : > { %p665_p7 = pnand %p664_p10, %p1016_p4 }
  0xa3   : > { %p670_p13 = por %p669_p11, %p668_p9 }
  0xa4   : > { %p666_p8 = pneg %p665_p7 }
  0xa5   : > { %p672_p5 = por %p671_p2, %p670_p13 }
  0xa7   : > { %p673_p1 = pnand %p672_p5, %p666_p8 }
  0xa9   : > { %676 = shalt.err (!%p673_p1)
}
  0xaa   : > { %s762_s21 = smov 128   ;;  %s763_s23 = smov 8  }
  0xab   : > { %494 = dma.vmem_to_hbm [thread:$0]  (%p1016_p4), %s936_s28, 256, %s941_s11, %s945_s14, %s762_s21, %s762_s21, %s763_s23  }
  0xac PF: > { %s365_s8 = sand.u32 1, %s729_s12   ;;  %p1017_p3 = scmp.ne.s32.totalorder %s1007_s25, 0 }
  0xad   : > { %p1018_p12 = scmp.ge.s32.totalorder %s753_s18, 2  ;;  %s366_s29 = scalar_lea.sflag [#allocation6], %s365_s8 }
  0xaf   : > { %p505_p0 = pnand %p1018_p12, %p1017_p3 }
  0xb1   : > { %722 = dma.done.wait (!%p505_p0), %s366_s29, 256  }
  0xb2   : > { %724 = vsyncadd (!%p505_p0), %s366_s29, 4294967040  ;;  %s20_s18 = sadd.s32 1, %s753_s18   ;;  %s1019_s12 = smov %s733_s13 }
  0xb3   : > { %p17_p6 = scmp.ge.s32.totalorder %s20_s18, 4   ;;  %s978_s13 = smov 0  }
  0xb4   : > { %s1020_s14 = smov %s741_s15  ;;  %s983_s15 = smov 0  }
  0xb5   : > { %s1021_s16 = smov %s749_s17  ;;  %s1022_s17 = smov %s1024_s20 }
  0xb6   :  { %19 = sbr.rel (!%p17_p6) target bundleno = 8 (0x8), region = 105 }
  0xbd   :  { %371 = vsyncpa [#allocation5], 1 }
  0xbe   :  { %373 = vsyncpa [#allocation5 + $0x1], 1 }
  0xbf   :  { %374 = vsyncpa [#allocation8], 1 }
  0xc0   :  { %375 = vsyncpa [#allocation6], 1 }
  0xc1   :  { %377 = vsyncpa [#allocation6 + $0x1], 1 }

</bundles_post_ra>
